<compile_context>
chip_gen: v6e
topology: v6e:2x2x1
jax: 0.10.0
libtpu: 0.0.40
codegen_flags: <defaults>
</compile_context>

<pallas_src>
import functools

import jax
import jax.numpy as jnp
from jax.experimental import pallas as pl
from jax.experimental.pallas import tpu as pltpu

BN_EPS = 1e-5


def _round_up(x, m):
    return (x + m - 1) // m * m


# ---------------------------------------------------------------------------
# Pass 1: conv-as-matmul on the MXU + per-tile partial BN statistics.
# Only the (1, C_out) partial sums go back to HBM; the pre-BN activations are
# never written (pass 2 recomputes them, which is cheaper than an f32 HBM
# round-trip at these shapes).
# ---------------------------------------------------------------------------
def conv_stats_kernel(patches_ref, w_ref, sum_ref, sq_ref):
    y = jnp.dot(patches_ref[...], w_ref[...],
                preferred_element_type=jnp.float32)           # (TM, C_out) f32
    sum_ref[0] = jnp.sum(y, axis=0, keepdims=True)            # (1, C_out)
    sq_ref[0] = jnp.sum(y * y, axis=0, keepdims=True)         # (1, C_out)


# ---------------------------------------------------------------------------
# Pass 2: recompute conv, finalize BN in-kernel (global stats -> fused
# scale/shift), apply affine + ReLU, and write the final activations.
# ---------------------------------------------------------------------------
def conv_bn_relu_kernel(patches_ref, w_ref, psum_ref, psq_ref,
                        gamma_ref, beta_ref, o_ref, *, inv_count):
    y = jnp.dot(patches_ref[...], w_ref[...],
                preferred_element_type=jnp.float32)           # (TM, C_out) f32
    total = jnp.sum(psum_ref[...], axis=0)                    # (1, C_out)
    total_sq = jnp.sum(psq_ref[...], axis=0)                  # (1, C_out)
    mean = total * inv_count
    # TODO(synk): E[y^2]-E[y]^2 can cancel in f32 at very large M with large
    # per-channel means; switch to mean-shifted accumulation if that regime
    # ever matters.
    var = jnp.maximum(total_sq * inv_count - mean * mean, 0.0)
    inv_std = jax.lax.rsqrt(var + BN_EPS)
    scale = gamma_ref[...] * inv_std                          # (1, C_out)
    shift = beta_ref[...] - mean * scale                      # (1, C_out)
    o_ref[...] = jnp.maximum(y * scale + shift, 0.0)


def _pick_tile_m(M, K, C_out, operand_bytes, block_m,
                 vmem_budget_bytes=12 * 1024 * 1024):
    """Rows per grid step, derived from a VMEM byte budget (v7x-safe)."""
    # Dominant per-row VMEM bytes of the heavier (pass-2) step:
    #   2 pipeline buffers of patches (lane-padded layout) + f32 matmul temp
    #   + 2 pipeline buffers of the f32 output (lane-padded layout).
    lanes = max(_round_up(C_out, 128), 128)
    per_row = 2 * _round_up(K, 128) * operand_bytes + 4 * lanes + 2 * 4 * lanes
    tm = min(_round_up(block_m, 8),
             max(8, (vmem_budget_bytes // per_row) // 8 * 8))
    tm = min(tm, _round_up(M, 8))
    if M > 8:   # keep >= 2 tiles so v7x's two TensorCores both get work
        tm = min(tm, _round_up((M + 1) // 2, 8))
    return max(8, tm)


def encoder_block(x, weight, bias, gamma, beta, *, stride=2, padding=1,
                  block_m=2048, compute_dtype=jnp.bfloat16):
    """x: (N, C_in, H, W) f32; weight: (C_out, C_in, 3, 3). Returns NCHW f32.

    `bias` is accepted for interface parity but unused: training-mode BN
    exactly cancels a per-channel conv bias.  `compute_dtype` sets the MXU
    operand dtype (bf16 default); accumulation and BN stats stay f32.
    """
    del bias  # exactly cancelled by the BN mean subtraction
    N, C_in, H, W = x.shape
    C_out = weight.shape[0]
    k = 3
    Ho = (H + 2 * padding - k) // stride + 1
    Wo = (W + 2 * padding - k) // stride + 1

    M = N * Ho * Wo
    K = C_in * k * k

    operand_bytes = jnp.dtype(compute_dtype).itemsize
    TM = _pick_tile_m(M, K, C_out, operand_bytes, block_m)
    M_pad = _round_up(M, TM)
    num_tiles = M_pad // TM

    # ---- glue: NHWC tap concat (channels stay last; K is NOT padded) ----
    x_nhwc = jnp.transpose(x, (0, 2, 3, 1))                      # (N, H, W, C_in)
    xp = jnp.pad(x_nhwc, ((0, 0), (padding, padding), (padding, padding), (0, 0)))
    taps = [xp[:, kh:kh + stride * Ho:stride, kw:kw + stride * Wo:stride, :]
            for kh in range(k) for kw in range(k)]
    pat = jnp.concatenate(taps, axis=-1).reshape(M, K).astype(compute_dtype)
    if M_pad != M:
        pat = jnp.pad(pat, ((0, M_pad - M), (0, 0)))

    # Weight in the same K ordering: K index = (kh*3 + kw)*C_in + c_in.
    w2 = weight.transpose(2, 3, 1, 0).reshape(K, C_out).astype(compute_dtype)

    gamma2 = gamma.astype(jnp.float32).reshape(1, C_out)
    beta2 = beta.astype(jnp.float32).reshape(1, C_out)

    cparams = pltpu.CompilerParams(
        dimension_semantics=("parallel",),           # M tiles are independent
        vmem_limit_bytes=32 * 1024 * 1024,           # safe on v5e/v6e/v7x
    )

    # ---- pass 1: per-tile partial BN statistics (no activation writeback) ----
    part_sum, part_sq = pl.pallas_call(
        conv_stats_kernel,
        out_shape=(
            jax.ShapeDtypeStruct((num_tiles, 1, C_out), jnp.float32),
            jax.ShapeDtypeStruct((num_tiles, 1, C_out), jnp.float32),
        ),
        grid=(num_tiles,),
        in_specs=[
            pl.BlockSpec((TM, K), lambda i: (i, 0)),
            pl.BlockSpec((K, C_out), lambda i: (0, 0)),   # VMEM-resident weight
        ],
        out_specs=(
            pl.BlockSpec((1, 1, C_out), lambda i: (i, 0, 0)),
            pl.BlockSpec((1, 1, C_out), lambda i: (i, 0, 0)),
        ),
        compiler_params=cparams,
    )(pat, w2)

    # ---- pass 2: recompute conv, finalize BN in-kernel, affine + ReLU ----
    out_flat = pl.pallas_call(
        functools.partial(conv_bn_relu_kernel, inv_count=1.0 / M),
        out_shape=jax.ShapeDtypeStruct((M_pad, C_out), jnp.float32),
        grid=(num_tiles,),
        in_specs=[
            pl.BlockSpec((TM, K), lambda i: (i, 0)),
            pl.BlockSpec((K, C_out), lambda i: (0, 0)),
            pl.BlockSpec((num_tiles, 1, C_out), lambda i: (0, 0, 0)),
            pl.BlockSpec((num_tiles, 1, C_out), lambda i: (0, 0, 0)),
            pl.BlockSpec((1, C_out), lambda i: (0, 0)),
            pl.BlockSpec((1, C_out), lambda i: (0, 0)),
        ],
        out_specs=pl.BlockSpec((TM, C_out), lambda i: (i, 0)),
        compiler_params=cparams,
    )(pat, w2, part_sum, part_sq, gamma2, beta2)

    out = out_flat[:M].reshape(N, Ho, Wo, C_out)
    # TODO(synk): downstream consumers could take NHWC directly and skip this
    # final transpose (one extra XLA pass over the output).
    return jnp.transpose(out, (0, 3, 1, 2))                      # back to NCHW


def _reference(x, weight, bias, gamma, beta, *, stride=2, padding=1):
    """Pure-JAX reference: conv (with bias) + training-mode BN + ReLU."""
    y = jax.lax.conv_general_dilated(
        x, weight,
        window_strides=(stride, stride),
        padding=((padding, padding), (padding, padding)),
        dimension_numbers=("NCHW", "OIHW", "NCHW"),
    ) + bias.reshape(1, -1, 1, 1)
    mean = jnp.mean(y, axis=(0, 2, 3), keepdims=True)
    var = jnp.mean((y - mean) ** 2, axis=(0, 2, 3), keepdims=True)
    y = (y - mean) * jax.lax.rsqrt(var + BN_EPS)
    y = y * gamma.reshape(1, -1, 1, 1) + beta.reshape(1, -1, 1, 1)
    return jnp.maximum(y, 0.0)


if __name__ == "__main__":
    key = jax.random.PRNGKey(0)
    k_x, k_w, k_b, k_g, k_be = jax.random.split(key, 5)

    N, C_in, H, W = 2, 4, 16, 16
    C_out = 8

    x = jax.random.normal(k_x, (N, C_in, H, W), dtype=jnp.float32)
    weight = 0.1 * jax.random.normal(k_w, (C_out, C_in, 3, 3), dtype=jnp.float32)
    bias = 0.05 * jax.random.normal(k_b, (C_out,), dtype=jnp.float32)
    gamma = 1.0 + 0.1 * jax.random.normal(k_g, (C_out,), dtype=jnp.float32)
    beta = 0.1 * jax.random.normal(k_be, (C_out,), dtype=jnp.float32)

    ref = jax.block_until_ready(_reference(x, weight, bias, gamma, beta))

    # Strict check with f32 MXU operands.
    out_f32 = jax.block_until_ready(
        encoder_block(x, weight, bias, gamma, beta, compute_dtype=jnp.float32))
    assert out_f32.shape == (N, C_out, H // 2, W // 2), out_f32.shape
    err32 = float(jnp.max(jnp.abs(out_f32 - ref)))
    assert jnp.allclose(out_f32, ref, atol=1e-4, rtol=1e-4), err32

    # Default path: bf16 MXU operands (f32 accumulation / BN) -> looser tol.
    out_bf16 = jax.block_until_ready(encoder_block(x, weight, bias, gamma, beta))
    assert out_bf16.shape == (N, C_out, H // 2, W // 2), out_bf16.shape
    err16 = float(jnp.max(jnp.abs(out_bf16 - ref)))
    assert jnp.allclose(out_bf16, ref, atol=5e-2, rtol=5e-2), err16

    print("KERNEL_OK")
</pallas_src>

<mosaic_0001>
module attributes {stable_mosaic.version = 11 : i64} {
  func.func @conv_stats_kernel(%arg0: i32, %arg1: memref<64x36xf32, #tpu.memory_space<vmem>>, %arg2: memref<36x8xf32, #tpu.memory_space<vmem>>, %arg3: memref<1x1x8xf32, #tpu.memory_space<vmem>>, %arg4: memref<1x1x8xf32, #tpu.memory_space<vmem>>) attributes {dimension_semantics = [#tpu.dimension_semantics<parallel>], iteration_bounds = array<i64: 2>, scalar_prefetch = 0 : i64, scratch_operands = 0 : i64, tpu.core_type = #tpu.core_type<tc>, window_params = [{transform_indices = @transform_0, window_bounds = array<i64: 64, 36>}, {pipeline_mode = #tpu.pipeline_mode<synchronous>, transform_indices = @transform_1, window_bounds = array<i64: 36, 8>}, {transform_indices = @transform_2, window_bounds = array<i64: 1, 1, 8>}, {transform_indices = @transform_3, window_bounds = array<i64: 1, 1, 8>}]} {
    %c0 = arith.constant 0 : index
    %c0_0 = arith.constant 0 : index
    %0 = vector.load %arg1[%c0, %c0_0] : memref<64x36xf32, #tpu.memory_space<vmem>>, vector<64x36xf32>
    %c0_1 = arith.constant 0 : index
    %c0_2 = arith.constant 0 : index
    %1 = vector.load %arg2[%c0_1, %c0_2] : memref<36x8xf32, #tpu.memory_space<vmem>>, vector<36x8xf32>
    %cst = arith.constant dense<0.000000e+00> : vector<64x8xf32>
    %2 = tpu.matmul %0, %1, %cst {dimension_numbers = #tpu.dot_dimension_numbers<[1], [0], [0], [1], [0, 0, 1, 1], [], []>} : vector<64x36xf32>, vector<36x8xf32>, vector<64x8xf32> -> vector<64x8xf32>
    %cst_3 = arith.constant dense<0.000000e+00> : vector<8xf32>
    %3 = vector.multi_reduction <add>, %2, %cst_3 [0] : vector<64x8xf32> to vector<8xf32>
    %4 = vector.shape_cast %3 : vector<8xf32> to vector<1x8xf32>
    %c0_4 = arith.constant 0 : index
    %c0_5 = arith.constant 0 : index
    %c0_6 = arith.constant 0 : index
    %5 = vector.load %arg3[%c0_4, %c0_5, %c0_6] : memref<1x1x8xf32, #tpu.memory_space<vmem>>, vector<1x1x8xf32>
    %6 = vector.shape_cast %5 : vector<1x1x8xf32> to vector<1x8xf32>
    %7 = vector.shape_cast %4 : vector<1x8xf32> to vector<1x1x8xf32>
    tpu.vector_store %arg3[%c0_4, %c0_5, %c0_6], %7 {strides = array<i32>} : memref<1x1x8xf32, #tpu.memory_space<vmem>>, vector<1x1x8xf32>,
    %8 = arith.mulf %2, %2 : vector<64x8xf32>
    %cst_7 = arith.constant dense<0.000000e+00> : vector<8xf32>
    %9 = vector.multi_reduction <add>, %8, %cst_7 [0] : vector<64x8xf32> to vector<8xf32>
    %10 = vector.shape_cast %9 : vector<8xf32> to vector<1x8xf32>
    %c0_8 = arith.constant 0 : index
    %c0_9 = arith.constant 0 : index
    %c0_10 = arith.constant 0 : index
    %11 = vector.load %arg4[%c0_8, %c0_9, %c0_10] : memref<1x1x8xf32, #tpu.memory_space<vmem>>, vector<1x1x8xf32>
    %12 = vector.shape_cast %11 : vector<1x1x8xf32> to vector<1x8xf32>
    %13 = vector.shape_cast %10 : vector<1x8xf32> to vector<1x1x8xf32>
    tpu.vector_store %arg4[%c0_8, %c0_9, %c0_10], %13 {strides = array<i32>} : memref<1x1x8xf32, #tpu.memory_space<vmem>>, vector<1x1x8xf32>,
    return
  }
  func.func @transform_0(%arg0: i32) -> (i32, i32) {
    %c0_i32 = arith.constant 0 : i32
    %c0_i32_0 = arith.constant 0 : i32
    return %arg0, %c0_i32 : i32, i32
  }
  func.func @transform_1(%arg0: i32) -> (i32, i32) {
    %c0_i32 = arith.constant 0 : i32
    %c0_i32_0 = arith.constant 0 : i32
    %c0_i32_1 = arith.constant 0 : i32
    return %c0_i32, %c0_i32_0 : i32, i32
  }
  func.func @transform_2(%arg0: i32) -> (i32, i32, i32) {
    %c0_i32 = arith.constant 0 : i32
    %c0_i32_0 = arith.constant 0 : i32
    %c0_i32_1 = arith.constant 0 : i32
    return %arg0, %c0_i32, %c0_i32_0 : i32, i32, i32
  }
  func.func @transform_3(%arg0: i32) -> (i32, i32, i32) {
    %c0_i32 = arith.constant 0 : i32
    %c0_i32_0 = arith.constant 0 : i32
    %c0_i32_1 = arith.constant 0 : i32
    return %arg0, %c0_i32, %c0_i32_0 : i32, i32, i32
  }
}

</mosaic_0001>

<bundles_post_ra>
// kernel: tpu_custom_call.1
= control target key start
LH: loop header
LB: loop body
LE: loop exit
PB: predicated region body
PF: predicated region fallthrough
CT: control target
= control target key end

     0   :  { %9 = vsyncpa [#allocation3], 0  ;;  %s892_s0 = inlined_call_operand.vmem [shape: f32[128,36], index: 0, kind: input, shape index: {}]   ;;  %s893_s1 = inlined_call_operand.vmem [shape: f32[36,8], index: 1, kind: input, shape index: {}]   ;;  %s894_s2 = inlined_call_operand.hbm [shape: f32[2,1,8], index: 2, kind: output, shape index: {0}]   ;;  %s895_s3 = inlined_call_operand.hbm [shape: f32[2,1,8], index: 3, kind: output, shape index: {1}]  }
   0x1   :  { %11 = vsyncpa [#allocation3 + $0x1], 0 }
   0x2   :  { %12 = vsyncpa [#allocation5], 0 }
   0x3   :  { %14 = vsyncpa [#allocation5 + $0x1], 0  ;;  %s716_s12 = smov 0   ;;  %s718_s13 = smov 0  }
   0x4   :  { %s720_s14 = smov 0   ;;  %s722_s15 = smov 0  }
   0x5 LB: > { %s737_s16 = sadd.s32 4294967295, %s692_s15   ;;  %s494_s17 = sadd.s32 4294967294, %s692_s15   ;;  %s692_s15 = sphi %s722_s15, %s901_s15   ;;  %s688_s14 = sphi %s720_s14, %s900_s14   ;;  %s684_s13 = sphi %s718_s13, %s899_s13   ;;  %s680_s12 = sphi %s716_s12, %s898_s12  }
   0x6   : > { %s741_s18 = sadd.s32 1, %s692_s15   ;;  %s74_s19 = sadd.s32 1, %s688_s14 }
   0x7   : > { %s71_s20 = ssub.s32 %s692_s15, %s741_s18  ;;  %p84_p0 = scmp.ne.s32.totalorder %s688_s14, %s684_s13 }
   0x8   : > { %p72_p1 = scmp.eq.s32.totalorder %s71_s20, 0  ;;  %p85_p2 = scmp.eq.s32.totalorder %s737_s16, 1 }
   0x9   : > { %p90_p3 = scmp.ne.s32.totalorder %s684_s13, %s680_s12  ;;  %p91_p4 = scmp.eq.s32.totalorder %s494_s17, 1 }
   0xa   : > { %s752_s21 = scalar_select %p72_p1, %s688_s14, %s74_s19  }
   0xb   : > { %p754_p5 = por %p85_p2, %p84_p0  ;;  %p758_p6 = por %p91_p4, %p90_p3 }
   0xc   : > { %p497_p7 = scmp.ge.s32.totalorder %s692_s15, 1  ;;  %p147_p8 = scmp.lt.s32.totalorder %s692_s15, 3 }
   0xe   : > { %p148_p9 = pnand %p497_p7, %p147_p8 }
   0xf   : > { %s498_s28 = sshll.u32 (!%p148_p9), %s737_s16, 3  ;;  %s808_s17 = sand.u32 (!%p148_p9), 1, %s684_s13  }
  0x10   : > { %151 = sbr.rel (%p148_p9) target bundleno = 291 (0x123), region = 28  ;;  %p175_p10 = scmp.lt.s32.totalorder (!%p148_p9), %s498_s28, 15 }
  0x11   : > { %s509_s19 = sshll.u32 (!%p148_p9), %s737_s16, 4  ;;  %s167_s20 = scalar_lea.vmem (!%p148_p9), [#allocation2], %s808_s17 }
  0x12   : > { %s398_s24 = sshll.u32 (!%p148_p9), %s167_s20, 4  ;;  %s173_s25 = scalar_lea.vmem (!%p148_p9), [#allocation4], %s808_s17  ;;  %s820_s24 = int_to_ptr.vmem [resolvable:$true] %s398_s24 }
  0x13   : > { %s411_s26 = sshll.u32 (!%p148_p9), %s173_s25, 4  ;;  %s818_s29 = scalar_lea.hbm (!%p148_p9), %s894_s2, %s509_s19  ;;  %s828_s26 = int_to_ptr.vmem [resolvable:$true] %s411_s26 }
  0x14   : > { %s826_s4 = scalar_lea.hbm (!%p148_p9), %s895_s3, %s509_s19  ;;  %s382_s5 = scalar_lea.sflag (!%p148_p9), [#allocation3], %s808_s17 }
  0x15   : > { %v192_v0 = vld [vmem:[%s893_s1 + $0x20] sm:$0xf]  ;;  %vm218_vm0 = vcmask 1043456   ;;  %v191_v1 = vld [vmem:[%s893_s1 + $0x18] sm:$0xff]  ;;  %v190_v2 = vld [vmem:[%s893_s1 + $0x10] sm:$0xff]  ;;  %s903_s28 = smov (!%p175_p10, %s498_s28), 15 }
  0x16   : > { %526 = vmatprep.subr.msk.mxu0 %vm218_vm0, %v192_v0  ;;  %548 = vmatprep.subr.msk.mxu1 %vm218_vm0, %v192_v0  ;;  %v189_v3 = vld [vmem:[%s893_s1 + $0x8] sm:$0xff]  ;;  %s499_s6 = sshll.u32 %s903_s28, 3  ;;  %vm193_vm1 = vcmask 293888   ;;  %v188_v4 = vld [vmem:[%s893_s1] sm:$0xff]  ;;  %vm327_vm2 = vcmask 64512   ;;  %vm349_vm3 = vcmask 57344  }
  0x17   : > { %527 = vmatpush3.msk.msra.mxu0 %vm218_vm0, %v192_v0  ;;  %553 = vmatpush3.msk.msra.mxu1 %vm218_vm0, %v192_v0  ;;  %s178_s11 = scalar_lea.vmem %s892_s0, %s499_s6  ;;  %s602_s6 = scalar_lea.vmem %s820_s24, 16 }
  0x18   : > { %528 = vmatprep.subr.mxu0 %v191_v1  ;;  %549 = vmatprep.subr.mxu1 %v191_v1  ;;  %v180_v5 = vld [vmem:[%s178_s11] sm:$0xff]  ;;  %v181_v6 = vld [vmem:[%s178_s11 + $0x8] sm:$0xff]  ;;  %v182_v7 = vld [vmem:[%s178_s11 + $0x10] sm:$0xff]  ;;  %p603_p11 = scmp.ne.s32.totalorder %s820_s24, %s602_s6  ;;  %s694_s7 = smov [#allocation2]  }
  0x19   : > { %529 = vmatpush3.msra.mxu0 %v191_v1  ;;  %554 = vmatpush3.msra.mxu1 %v191_v1  ;;  %v184_v8 = vld [vmem:[%s178_s11 + $0x20] sm:$0xff]  ;;  %v185_v9 = vld [vmem:[%s178_s11 + $0x28] sm:$0xff]  ;;  %v186_v10 = vld [vmem:[%s178_s11 + $0x30] sm:$0xff]  ;;  %s606_s8 = sshll.u32 %s694_s7, 4  ;;  %s607_s8 = int_to_ptr.vmem [resolvable:$false] %s606_s8 }
  0x1a   : > { %530 = vmatprep.subr.mxu0 %v190_v2  ;;  %550 = vmatprep.subr.mxu1 %v190_v2  ;;  %v183_v11 = vld [vmem:[%s178_s11 + $0x18] sm:$0xff]  ;;  %p604_p12 = pnand %p603_p11, %p754_p5  ;;  %s608_s9 = scalar_lea.vmem %s607_s8, 32 }
  0x1b   : > { %531 = vmatpush3.msra.mxu0 %v190_v2  ;;  %555 = vmatpush3.msra.mxu1 %v190_v2  ;;  %v187_v12 = vld [vmem:[%s178_s11 + $0x38] sm:$0xff]  ;;  %p609_p0 = scmp.lt.s32.totalorder %s820_s24, %s607_s8  ;;  %p610_p1 = scmp.lt.s32.totalorder %s608_s9, %s602_s6 }
  0x1c   : > { %532 = vmatprep.subr.mxu0 %v189_v3  ;;  %551 = vmatprep.subr.mxu1 %v189_v3  ;;  %p605_p13 = pneg %p604_p12 }
  0x1d   : > { %533 = vmatpush3.msra.mxu0 %v189_v3  ;;  %536 = vmatprep.mubr.msk.f32.mxu0 %vm193_vm1, %v180_v5  ;;  %p611_p2 = por %p610_p1, %p609_p0 }
  0x1e   : > { %534 = vmatprep.subr.mxu0 %v188_v4  ;;  %556 = vmatpush3.msra.mxu1 %v189_v3 }
  0x1f   : > { %535 = vmatpush3.msra.mxu0 %v188_v4  ;;  %552 = vmatprep.subr.mxu1 %v188_v4  ;;  %p612_p3 = pnand %p611_p2, %p605_p13 }
  0x20   : > { %537 = vmatmul.mubr.msk.f32.vlgmr.msra.gmra.mxu0 %vm193_vm1, %v181_v6  ;;  %557 = vmatpush3.msra.mxu1 %v188_v4 }
  0x21   : > { %539 = vmatprep.mubr.msk.f32.mxu0 %vm193_vm1, %v182_v7  ;;  %542 = vmatprep.mubr.msk.f32.mxu1 %vm193_vm1, %v184_v8 }
  0x22   : > { %543 = vmatmul.mubr.msk.f32.vlgmr.msra.gmra.mxu1 %vm193_vm1, %v185_v9 }
  0x23   : > { %545 = vmatprep.mubr.msk.f32.mxu1 %vm193_vm1, %v186_v10 }
  0x24   : > { %540 = vmatmul.mubr.msk.f32.gmra.mxu0 %vm193_vm1, %v183_v11 }
  0x26   : > { %546 = vmatmul.mubr.msk.f32.gmra.mxu1 %vm193_vm1, %v187_v12 }
  0xe0   : > { %v538_v13 = vpop.f32.mrf.mxu0 }
  0xe1   : > { %v352_v16 = vmul.f32 %v538_v13, %v538_v13  ;;  %v329_v21 = vsel %vm327_vm2, %v538_v13, 0.0 }
  0xe2   : > { %v288_v14 = vpop.f32.mrf.mxu0  ;;  %v544_v15 = vpop.f32.mrf.mxu1 }
  0xe3   : > { %v328_v17 = vsel %vm327_vm2, %v288_v14, 0.0  ;;  %v351_v18 = vmul.f32 %v288_v14, %v288_v14  ;;  %v360_v26 = vsel %vm327_vm2, %v352_v16, 0.0  ;;  %v356_v39 = vmul.f32 %v544_v15, %v544_v15 }
  0xe4   : > { %v541_v19 = vpop.f32.mrf.mxu0  ;;  %v308_v20 = vpop.f32.mrf.mxu1  ;;  %v330_v23 = vadd.f32 %v329_v21, %v328_v17  ;;  %v337_v43 = vsel %vm327_vm2, %v544_v15, 0.0 }
  0xe5   : > { %v359_v22 = vsel %vm327_vm2, %v351_v18, 0.0  ;;  %v354_v27 = vmul.f32 %v541_v19, %v541_v19  ;;  %v333_v32 = vsel %vm327_vm2, %v541_v19, 0.0  ;;  %v355_v34 = vmul.f32 %v308_v20, %v308_v20 }
  0xe6   : > { %v298_v24 = vpop.f32.mrf.mxu0  ;;  %v547_v25 = vpop.f32.mrf.mxu1  ;;  %v361_v30 = vadd.f32 %v360_v26, %v359_v22  ;;  %v335_v40 = vsel %vm327_vm2, %v308_v20, 0.0  ;;  %v368_v48 = vsel %vm327_vm2, %v356_v39, 0.0 }
  0xe7   : > { %v331_v28 = vsel %vm327_vm2, %v298_v24, 0.0  ;;  %v353_v29 = vmul.f32 %v298_v24, %v298_v24  ;;  %v364_v38 = vsel %vm327_vm2, %v354_v27, 0.0  ;;  %v366_v44 = vsel %vm327_vm2, %v355_v34, 0.0 }
  0xe8   : > { %v332_v31 = vadd.f32 %v331_v28, %v330_v23  ;;  %v318_v37 = vpop.f32.mrf.mxu1  ;;  %v358_v49 = vmul.f32 %v547_v25, %v547_v25  ;;  %v341_v53 = vsel %vm327_vm2, %v547_v25, 0.0 }
  0xe9   : > { %v362_v33 = vsel %vm327_vm2, %v353_v29, 0.0  ;;  %v357_v45 = vmul.f32 %v318_v37, %v318_v37  ;;  %v339_v50 = vsel %vm327_vm2, %v318_v37, 0.0 }
  0xea   : > { %v334_v35 = vadd.f32 %v333_v32, %v332_v31  ;;  %v363_v36 = vadd.f32 %v362_v33, %v361_v30  ;;  %v372_v57 = vsel %vm327_vm2, %v358_v49, 0.0 }
  0xeb   : > { %v370_v54 = vsel %vm327_vm2, %v357_v45, 0.0 }
  0xec   : > { %v365_v41 = vadd.f32 %v364_v38, %v363_v36  ;;  %v336_v42 = vadd.f32 %v335_v40, %v334_v35 }
  0xee   : > { %v367_v46 = vadd.f32 %v366_v44, %v365_v41  ;;  %v338_v47 = vadd.f32 %v337_v43, %v336_v42 }
  0xf0   : > { %v340_v51 = vadd.f32 %v339_v50, %v338_v47  ;;  %v369_v52 = vadd.f32 %v368_v48, %v367_v46 }
  0xf2   : > { %v342_v55 = vadd.f32 %v341_v53, %v340_v51  ;;  %v371_v56 = vadd.f32 %v370_v54, %v369_v52 }
  0xf4   : > { %v343_v58 = vrot.slane %v342_v55, 4  ;;  %v373_v59 = vadd.f32 %v372_v57, %v371_v56 }
  0xf6   : > { %v344_v60 = vadd.f32 %v343_v58, %v342_v55  ;;  %v374_v61 = vrot.slane %v373_v59, 4 }
  0xf8   : > { %v345_v62 = vrot.slane %v344_v60, 2  ;;  %v375_v63 = vadd.f32 %v374_v61, %v373_v59 }
  0xfa   : > { %v346_v0 = vadd.f32 %v345_v62, %v344_v60  ;;  %v376_v1 = vrot.slane %v375_v63, 2 }
  0xfc   : > { %v347_v2 = vrot.slane %v346_v0, 1  ;;  %v377_v3 = vadd.f32 %v376_v1, %v375_v63 }
  0xfe   : > { %v348_v4 = vadd.f32 %v347_v2, %v346_v0  ;;  %v378_v5 = vrot.slane %v377_v3, 1 }
 0x100   : > { %350 = vst.msk [vmem:[%s167_s20] sm:$0x1] %vm349_vm3, %v348_v4  ;;  %v379_v6 = vadd.f32 %v378_v5, %v377_v3 }
 0x101   : > { %615 = shalt.err (!%p612_p3)
}
 0x102   : > { %s616_s10 = scalar_lea.hbm %s818_s29, 16  ;;  %s620_s20 = scalar_lea.hbm %s894_s2, 32 }
 0x103   : > { %p617_p4 = scmp.ne.s32.totalorder %s818_s29, %s616_s10  ;;  %p621_p9 = scmp.lt.s32.totalorder %s818_s29, %s894_s2 }
 0x104   : > { %p622_p10 = scmp.lt.s32.totalorder %s620_s20, %s616_s10 }
 0x105   : > { %p618_p7 = pnand %p617_p4, %p754_p5 }
 0x106   : > { %p623_p11 = por %p622_p10, %p621_p9 }
 0x107   : > { %p619_p8 = pneg %p618_p7 }
 0x109   : > { %p624_p12 = pnand %p623_p11, %p619_p8 }
 0x10b   : > { %627 = shalt.err (!%p624_p12)
}
 0x10c   : > { %558 = dma.vmem_to_hbm [thread:$0]  (%p754_p5), %s820_s24, 16, %s818_s29, %s382_s5   ;;  %380 = vst.msk [vmem:[%s173_s25] sm:$0x1] %vm349_vm3, %v379_v6 }
 0x10d   : > { %s386_s16 = scalar_lea.sflag [#allocation5], %s808_s17  ;;  %s628_s30 = scalar_lea.vmem %s828_s26, 16 }
 0x10e   : > { %p629_p13 = scmp.ne.s32.totalorder %s828_s26, %s628_s30  ;;  %s695_s6 = smov [#allocation4]  }
 0x10f   : > { %s632_s7 = sshll.u32 %s695_s6, 4  ;;  %s633_s7 = int_to_ptr.vmem [resolvable:$false] %s632_s7 }
 0x110   : > { %p630_p0 = pnand %p629_p13, %p754_p5  ;;  %s634_s8 = scalar_lea.vmem %s633_s7, 32 }
 0x111   : > { %p635_p2 = scmp.lt.s32.totalorder %s828_s26, %s633_s7  ;;  %p636_p3 = scmp.lt.s32.totalorder %s634_s8, %s628_s30 }
 0x112   : > { %p631_p1 = pneg %p630_p0 }
 0x113   : > { %p637_p4 = por %p636_p3, %p635_p2 }
 0x115   : > { %p638_p7 = pnand %p637_p4, %p631_p1 }
 0x117   : > { %641 = shalt.err (!%p638_p7)
}
 0x118   : > { %s642_s24 = scalar_lea.hbm %s826_s4, 16  ;;  %s646_s29 = scalar_lea.hbm %s895_s3, 32 }
 0x119   : > { %p643_p8 = scmp.ne.s32.totalorder %s826_s4, %s642_s24  ;;  %p647_p11 = scmp.lt.s32.totalorder %s826_s4, %s895_s3 }
 0x11a   : > { %p648_p12 = scmp.lt.s32.totalorder %s646_s29, %s642_s24 }
 0x11b   : > { %p644_p9 = pnand %p643_p8, %p754_p5 }
 0x11c   : > { %p649_p13 = por %p648_p12, %p647_p11 }
 0x11d   : > { %p645_p10 = pneg %p644_p9 }
 0x11f   : > { %p650_p0 = pnand %p649_p13, %p645_p10 }
 0x121   : > { %653 = shalt.err (!%p650_p0)
}
 0x122   : > { %559 = dma.vmem_to_hbm [thread:$0]  (%p754_p5), %s828_s26, 16, %s826_s4, %s386_s16  }
 0x123 PF: > { %p569_p1 = scmp.ge.s32.totalorder %s692_s15, 2  ;;  %s423_s10 = sand.u32 1, %s680_s12  }
 0x124   : > { %s424_s11 = scalar_lea.sflag [#allocation3], %s423_s10 }
 0x125   : > { %p563_p2 = pnand %p569_p1, %p758_p6 }
 0x127   : > { %p564_p3 = pneg %p563_p2 }
 0x129   : > { %671 = dma.done.wait (%p564_p3), %s424_s11, 16  }
 0x12a   : > { %673 = vsyncadd (%p564_p3), %s424_s11, 4294967280  ;;  %s432_s19 = scalar_lea.sflag [#allocation5], %s423_s10 }
 0x12b   : > { %675 = dma.done.wait (%p564_p3), %s432_s19, 16  }
 0x12c   : > { %677 = vsyncadd (%p564_p3), %s432_s19, 4294967280  ;;  %p17_p5 = scmp.ge.s32.totalorder %s741_s18, 4   ;;  %s898_s12 = smov %s684_s13 }
 0x12d   : > { %s899_s13 = smov %s688_s14  ;;  %s900_s14 = smov %s752_s21 }
 0x12e   : > { %s901_s15 = smov %s741_s18  ;;  %19 = sbr.rel (!%p17_p5) target bundleno = 5 (0x5), region = 80 }
 0x133   :  { %436 = vsyncpa [#allocation3], 1 }
 0x134   :  { %438 = vsyncpa [#allocation3 + $0x1], 1 }
 0x135   :  { %439 = vsyncpa [#allocation5], 1 }
 0x136   :  { %441 = vsyncpa [#allocation5 + $0x1], 1 }

</bundles_post_ra>
